<compile_context>
chip_gen: v5e
topology: v5e:2x2
jax: 0.10.0
libtpu: 0.0.40
codegen_flags: <defaults>
</compile_context>

<pallas_src>
import math
import functools

import jax
import jax.numpy as jnp
from jax.experimental import pallas as pl
from jax.experimental.pallas import tpu as pltpu


DEFAULT_SEQ_TILE = 256   # multiple of 128; good for v5e/v6e/v7x MXU tiles.
# TODO(synk): per-generation tk (e.g. 128 on v7x for very large h*d_k) and
# pipeline_mode=pl.Buffered(3) on the KV specs if profiling shows exposed DMA.


def _round_up(x, m):
    return ((x + m - 1) // m) * m


def _vmem_limit_bytes():
    """Generation-aware scoped-VMEM request: ~3/4 of physical capacity
    (=> ~48 MiB on v7x's 64 MiB, 96 MiB on v5e/v6e's 128 MiB)."""
    cap = 128 * 1024 * 1024
    try:
        info = pltpu.get_tpu_info()
        cap = int(getattr(info, "vmem_capacity_bytes", cap) or cap)
    except Exception:
        pass
    return min(96 * 1024 * 1024, (3 * cap) // 4)


def _tile_and_pad(s, pref):
    """Pick (tile, padded_len).  Short sequences become one sublane-aligned
    tile; long sequences are padded to a multiple of 128 and tiled with a
    128-multiple tile <= pref (lane/sublane friendly, no tiny-divisor blocks).
    """
    pref = max(128, _round_up(pref, 128))
    if s <= pref:
        t = max(8, _round_up(s, 8))
        return t, t
    p = _round_up(s, 128)
    for t in range(pref, 127, -128):
        if p % t == 0:
            return t, p
    return 128, p


# ---------------------------------------------------------------------------
# Fused projection kernel: x @ W_t + b_t (t = q/k/v roles sharing this input),
# head-split written directly to (h, ts, d_k) output blocks.
# ---------------------------------------------------------------------------

def _proj_split_heads_kernel(x_ref, *refs, n_out, n_heads, d_k, scales):
    """refs = (w_0..w_{n-1}, b_0..b_{n-1}, o_0..o_{n-1}).
    x_ref: (ts, D); w: (D, D); b: (1, D) f32; o: (n_heads, ts, d_k)."""
    x = x_ref[...]
    for t in range(n_out):
        w_ref = refs[t]
        b_ref = refs[n_out + t]
        o_ref = refs[2 * n_out + t]
        acc = jnp.dot(x, w_ref[...], preferred_element_type=jnp.float32)
        acc = acc + b_ref[...]
        if scales[t] != 1.0:               # 1/sqrt(d_k) folded into Q once
            acc = acc * scales[t]
        for hh in range(n_heads):          # head split done once, in VMEM
            o_ref[hh] = acc[:, hh * d_k:(hh + 1) * d_k].astype(o_ref.dtype)


def _project_split_heads(x, weights, biases, scales, *, n_heads, d_k,
                         seq_tile, out_dtype, vmem_limit):
    """x: (B, S_pad, D) (already padded).  Returns one (B, h, S_pad, d_k)
    array per weight/bias pair, all produced by a single pallas_call."""
    B, S, D = x.shape
    ts = seq_tile
    n_out = len(weights)
    x_spec = pl.BlockSpec((None, ts, D), lambda b, i: (b, i, 0))
    w_spec = pl.BlockSpec((D, D), lambda b, i: (0, 0))
    b_spec = pl.BlockSpec((1, D), lambda b, i: (0, 0))
    o_spec = pl.BlockSpec((None, n_heads, ts, d_k), lambda b, i: (b, 0, i, 0))

    outs = pl.pallas_call(
        functools.partial(_proj_split_heads_kernel, n_out=n_out,
                          n_heads=n_heads, d_k=d_k, scales=tuple(scales)),
        out_shape=tuple(jax.ShapeDtypeStruct((B, n_heads, S, d_k), out_dtype)
                        for _ in range(n_out)),
        grid_spec=pltpu.PrefetchScalarGridSpec(
            num_scalar_prefetch=0,
            grid=(B, S // ts),
            in_specs=[x_spec] + [w_spec] * n_out + [b_spec] * n_out,
            out_specs=[o_spec] * n_out,
        ),
        compiler_params=pltpu.CompilerParams(
            dimension_semantics=("parallel", "parallel"),
            vmem_limit_bytes=vmem_limit),
    )(x, *weights, *biases)
    if not isinstance(outs, (list, tuple)):
        outs = (outs,)
    return tuple(outs)


# ---------------------------------------------------------------------------
# Flash attention + fused head-concat / output projection.
# ---------------------------------------------------------------------------

def _flash_mha_kernel(q_ref, k_ref, v_ref, wo_ref, bo_ref, out_ref,
                      m_sc, l_sc, acc_sc, *, kv_len, kv_tile, mask_kv):
    """Grid (B, n_q, n_kv); KV axis is the reduction ("arbitrary") axis.

    q_ref:        (h, tq, d_k)   (already scaled by 1/sqrt(d_k))
    k_ref, v_ref: (h, tk, d_k)
    wo_ref:       (h, d_k, D)    bo_ref: (1, D)     out_ref: (tq, D)
    scratch:      m_sc / l_sc (h, tq, 1) f32, acc_sc (h, tq, d_k) f32
    """
    kv_idx = pl.program_id(2)
    n_heads = q_ref.shape[0]

    @pl.when(kv_idx == 0)
    def _():
        m_sc[...] = jnp.full_like(m_sc, -jnp.inf)
        l_sc[...] = jnp.zeros_like(l_sc)
        acc_sc[...] = jnp.zeros_like(acc_sc)

    # Scores (h, tq, tk) f32: last-axis contraction of both operands (no
    # explicit K transpose), batched over the leading head axis.
    s = jnp.einsum("hqd,hkd->hqk", q_ref[...], k_ref[...],
                   preferred_element_type=jnp.float32)

    if mask_kv:   # static flag: only emitted when Skv was padded
        kv_pos = kv_idx * kv_tile + jax.lax.broadcasted_iota(
            jnp.int32, (1, 1, kv_tile), 2)
        s = jnp.where(kv_pos < kv_len, s, -1e30)

    # Online softmax update.
    m_prev = m_sc[...]
    m_new = jnp.maximum(m_prev, jnp.max(s, axis=-1, keepdims=True))
    alpha = jnp.exp(m_prev - m_new)
    p = jnp.exp(s - m_new)

    l_sc[...] = alpha * l_sc[...] + jnp.sum(p, axis=-1, keepdims=True)
    acc_sc[...] = alpha * acc_sc[...] + jnp.einsum(
        "hqk,hkd->hqd", p.astype(v_ref.dtype), v_ref[...],
        preferred_element_type=jnp.float32)
    m_sc[...] = m_new

    @pl.when(kv_idx == pl.num_programs(2) - 1)
    def _():
        inv_l = 1.0 / l_sc[...]            # exact divide; epilogue-only cost
        # Fused concat + output projection accumulated straight into a single
        # (tq, D) f32 value: out = sum_h o_h @ Wo[h] + bo.
        acc = None
        for hh in range(n_heads):
            o_h = (acc_sc[hh] * inv_l[hh]).astype(wo_ref.dtype)   # (tq, d_k)
            part = jnp.dot(o_h, wo_ref[hh],
                           preferred_element_type=jnp.float32)    # (tq, D)
            acc = part if acc is None else acc + part
        out_ref[...] = (acc + bo_ref[...]).astype(out_ref.dtype)


def _flash_attention(q, k, v, wo3, bo, *, out_dtype, kv_len, q_tile, kv_tile,
                     vmem_limit):
    B, n_heads, sq_p, d_k = q.shape
    skv_p = k.shape[2]
    D = wo3.shape[2]
    n_q, n_kv = sq_p // q_tile, skv_p // kv_tile
    mask_kv = skv_p != kv_len

    q_spec = pl.BlockSpec((None, n_heads, q_tile, d_k),
                          lambda b, i, j: (b, 0, i, 0))
    kv_spec = pl.BlockSpec((None, n_heads, kv_tile, d_k),
                           lambda b, i, j: (b, 0, j, 0))
    wo_spec = pl.BlockSpec((n_heads, d_k, D), lambda b, i, j: (0, 0, 0))
    bo_spec = pl.BlockSpec((1, D), lambda b, i, j: (0, 0))
    out_spec = pl.BlockSpec((None, q_tile, D), lambda b, i, j: (b, i, 0))

    return pl.pallas_call(
        functools.partial(_flash_mha_kernel, kv_len=kv_len, kv_tile=kv_tile,
                          mask_kv=mask_kv),
        out_shape=jax.ShapeDtypeStruct((B, sq_p, D), out_dtype),
        grid_spec=pltpu.PrefetchScalarGridSpec(
            num_scalar_prefetch=0,
            grid=(B, n_q, n_kv),
            in_specs=[q_spec, kv_spec, kv_spec, wo_spec, bo_spec],
            out_specs=out_spec,
            scratch_shapes=[pltpu.VMEM((n_heads, q_tile, 1), jnp.float32),
                            pltpu.VMEM((n_heads, q_tile, 1), jnp.float32),
                            pltpu.VMEM((n_heads, q_tile, d_k), jnp.float32)],
        ),
        compiler_params=pltpu.CompilerParams(
            dimension_semantics=("parallel", "parallel", "arbitrary"),
            vmem_limit_bytes=vmem_limit),
    )(q, k, v, wo3, bo)


# ---------------------------------------------------------------------------
# Public wrapper
# ---------------------------------------------------------------------------

def multi_headed_attention(query, key, value, params, *, h, mask=None,
                           compute_dtype=jnp.bfloat16,
                           seq_tile=DEFAULT_SEQ_TILE):
    """query: (B, Sq, D); key/value: (B, Skv, D) -> (B, Sq, D).

    compute_dtype feeds the MXU (bf16 default, f32 accumulation and softmax
    statistics); pass jnp.float32 for full-f32 operands.
    """
    # TODO(synk): explicit attention mask and train-mode dropout on p_attn are
    # not implemented; this matches the reference forward's default
    # (mask=None, dropout never applied inside attention()).
    assert mask is None
    B, Sq, D = query.shape
    Bk, Skv, Dk = key.shape
    assert value.shape == key.shape and Bk == B and Dk == D
    assert D % h == 0
    d_k = D // h
    out_dtype = query.dtype
    cdt = compute_dtype if compute_dtype is not None else query.dtype
    scale = 1.0 / math.sqrt(d_k)
    vmem_limit = _vmem_limit_bytes()

    q_tile, sq_p = _tile_and_pad(Sq, seq_tile)
    kv_tile, skv_p = _tile_and_pad(Skv, seq_tile)

    wq, wk, wv, wo = (params[n].astype(cdt) for n in ("wq", "wk", "wv", "wo"))
    bq, bk, bv, bo = (params[n].astype(jnp.float32)
                      for n in ("bq", "bk", "bv", "bo"))

    # Fused Q/K/V projections, grouped by input identity so each distinct
    # activation array is read from HBM exactly once (self-attention => one
    # pallas_call producing q, k and v from a single read of x).
    roles = [("q", query, wq, bq, scale, sq_p, q_tile),
             ("k", key,   wk, bk, 1.0,   skv_p, kv_tile),
             ("v", value, wv, bv, 1.0,   skv_p, kv_tile)]
    groups = []   # (input_array, padded_len, tile, [roles])
    for r in roles:
        for g in groups:
            if g[0] is r[1]:
                g[3].append(r)
                break
        else:
            groups.append((r[1], r[5], r[6], [r]))

    projected = {}
    for x, s_p, ts, rs in groups:
        xp = x.astype(cdt)
        if s_p != x.shape[1]:
            xp = jnp.pad(xp, ((0, 0), (0, s_p - x.shape[1]), (0, 0)))
        outs = _project_split_heads(
            xp,
            [r[2] for r in rs], [r[3] for r in rs], [r[4] for r in rs],
            n_heads=h, d_k=d_k, seq_tile=ts, out_dtype=cdt,
            vmem_limit=vmem_limit)
        for r, o in zip(rs, outs):
            projected[r[0]] = o

    q, k, v = projected["q"], projected["k"], projected["v"]
    wo3 = wo.reshape(h, d_k, D)   # per-head slabs of the output projection

    out = _flash_attention(q, k, v, wo3, bo, out_dtype=out_dtype, kv_len=Skv,
                           q_tile=q_tile, kv_tile=kv_tile,
                           vmem_limit=vmem_limit)
    if sq_p != Sq:
        out = out[:, :Sq, :]
    return out


# ---------------------------------------------------------------------------
# Pure-JAX reference (mirrors the PyTorch forward, mask=None, eval), computed
# at HIGHEST matmul precision so it serves as the numerical ground truth.
# ---------------------------------------------------------------------------

def _reference(query, key, value, params, *, h):
    B, Sq, D = query.shape
    d_k = D // h
    hp = jax.lax.Precision.HIGHEST

    def lin(x, w, b):
        return jnp.dot(x, w, precision=hp) + b[0]

    q = lin(query, params["wq"], params["bq"]).reshape(B, -1, h, d_k).transpose(0, 2, 1, 3)
    k = lin(key,   params["wk"], params["bk"]).reshape(B, -1, h, d_k).transpose(0, 2, 1, 3)
    v = lin(value, params["wv"], params["bv"]).reshape(B, -1, h, d_k).transpose(0, 2, 1, 3)
    scores = jnp.einsum("bhqd,bhkd->bhqk", q, k, precision=hp) / math.sqrt(d_k)
    p = jax.nn.softmax(scores, axis=-1)
    x = jnp.einsum("bhqk,bhkd->bhqd", p, v,
                   precision=hp).transpose(0, 2, 1, 3).reshape(B, -1, D)
    return lin(x, params["wo"], params["bo"])


if __name__ == "__main__":
    B, S, D, H = 2, 8, 32, 4   # batch, seq, d_model, heads (d_k = 8)

    root = jax.random.PRNGKey(0)
    keys = jax.random.split(root, 12)

    # Weights stored pre-transposed (in_features, out_features) so kernels
    # compute y = x @ W + b, equivalent to PyTorch's y = x @ weight.T + bias.
    def init_w(k):
        return jax.random.normal(k, (D, D), jnp.float32) / math.sqrt(D)

    def init_b(k):
        return jax.random.normal(k, (1, D), jnp.float32) * 0.01

    params = {
        "wq": init_w(keys[0]), "wk": init_w(keys[1]),
        "wv": init_w(keys[2]), "wo": init_w(keys[3]),
        "bq": init_b(keys[4]), "bk": init_b(keys[5]),
        "bv": init_b(keys[6]), "bo": init_b(keys[7]),
    }

    query = jax.random.normal(keys[8],  (B, S, D), jnp.float32)
    key_  = jax.random.normal(keys[9],  (B, S, D), jnp.float32)
    value = jax.random.normal(keys[10], (B, S, D), jnp.float32)

    ref = _reference(query, key_, value, params, h=H)

    # f32 MXU-operand path.  Tolerance accounts for the backend's *default*
    # f32 matmul precision (bf16-rounded operands), which perturbs the kernel
    # and the HIGHEST-precision reference differently.
    out_f32 = multi_headed_attention(query, key_, value, params, h=H,
                                     compute_dtype=jnp.float32)
    out_f32 = jax.block_until_ready(out_f32)
    assert out_f32.shape == (B, S, D)
    assert jnp.allclose(out_f32, ref, atol=8e-2, rtol=8e-2), "f32 mismatch vs reference"

    # Default path: bf16 MXU operands with f32 accumulation / softmax stats.
    out_bf16 = multi_headed_attention(query, key_, value, params, h=H)
    out_bf16 = jax.block_until_ready(out_bf16)
    assert out_bf16.shape == (B, S, D)
    assert jnp.allclose(out_bf16, ref, atol=2e-1, rtol=1e-1), "bf16 mismatch vs reference"

    # Self-attention with a ragged length: exercises the fused single-read
    # QKV projection, sequence padding and KV tail masking.
    S2 = 20
    x2 = jax.random.normal(keys[11], (B, S2, D), jnp.float32)
    ref2 = _reference(x2, x2, x2, params, h=H)
    out2 = multi_headed_attention(x2, x2, x2, params, h=H,
                                  compute_dtype=jnp.float32)
    out2 = jax.block_until_ready(out2)
    assert out2.shape == (B, S2, D)
    assert jnp.allclose(out2, ref2, atol=8e-2, rtol=8e-2), "self-attn mismatch vs reference"

    print("KERNEL_OK")
</pallas_src>

<mosaic_0001>
module attributes {stable_mosaic.version = 11 : i64} {
  func.func @_proj_split_heads_kernel(%arg0: i32, %arg1: i32, %arg2: memref<1x8x32xf32, #tpu.memory_space<vmem>>, %arg3: memref<32x32xf32, #tpu.memory_space<vmem>>, %arg4: memref<1x32xf32, #tpu.memory_space<vmem>>, %arg5: memref<1x4x8x8xf32, #tpu.memory_space<vmem>>) attributes {dimension_semantics = [#tpu.dimension_semantics<parallel>, #tpu.dimension_semantics<parallel>], iteration_bounds = array<i64: 2, 1>, scalar_prefetch = 0 : i64, scratch_operands = 0 : i64, tpu.core_type = #tpu.core_type<tc>, window_params = [{transform_indices = @transform_0, window_bounds = array<i64: 1, 8, 32>}, {pipeline_mode = #tpu.pipeline_mode<synchronous>, transform_indices = @transform_1, window_bounds = array<i64: 32, 32>}, {pipeline_mode = #tpu.pipeline_mode<synchronous>, transform_indices = @transform_2, window_bounds = array<i64: 1, 32>}, {transform_indices = @transform_3, window_bounds = array<i64: 1, 4, 8, 8>}]} {
    %c0 = arith.constant 0 : index
    %c0_0 = arith.constant 0 : index
    %c0_1 = arith.constant 0 : index
    %0 = vector.load %arg2[%c0, %c0_0, %c0_1] : memref<1x8x32xf32, #tpu.memory_space<vmem>>, vector<1x8x32xf32>
    %1 = vector.shape_cast %0 : vector<1x8x32xf32> to vector<8x32xf32>
    %c0_2 = arith.constant 0 : index
    %c0_3 = arith.constant 0 : index
    %2 = vector.load %arg3[%c0_2, %c0_3] : memref<32x32xf32, #tpu.memory_space<vmem>>, vector<32x32xf32>
    %cst = arith.constant dense<0.000000e+00> : vector<8x32xf32>
    %3 = tpu.matmul %1, %2, %cst {dimension_numbers = #tpu.dot_dimension_numbers<[1], [0], [0], [1], [0, 0, 1, 1], [], []>} : vector<8x32xf32>, vector<32x32xf32>, vector<8x32xf32> -> vector<8x32xf32>
    %c0_4 = arith.constant 0 : index
    %c0_5 = arith.constant 0 : index
    %4 = vector.load %arg4[%c0_4, %c0_5] : memref<1x32xf32, #tpu.memory_space<vmem>>, vector<1x32xf32>
    %5 = vector.broadcast %4 : vector<1x32xf32> to vector<8x32xf32>
    %6 = arith.addf %3, %5 : vector<8x32xf32>
    %cst_6 = arith.constant 0.353553385 : f32
    %7 = vector.broadcast %cst_6 : f32 to vector<8x32xf32>
    %8 = arith.mulf %6, %7 : vector<8x32xf32>
    %9 = vector.extract_strided_slice %8 {offsets = [0, 0], sizes = [8, 8], strides = [1, 1]} : vector<8x32xf32> to vector<8x8xf32>
    %c0_7 = arith.constant 0 : index
    %c0_8 = arith.constant 0 : index
    %c0_9 = arith.constant 0 : index
    %c0_10 = arith.constant 0 : index
    %10 = vector.load %arg5[%c0_7, %c0_8, %c0_9, %c0_10] : memref<1x4x8x8xf32, #tpu.memory_space<vmem>>, vector<1x1x8x8xf32>
    %11 = vector.shape_cast %10 : vector<1x1x8x8xf32> to vector<8x8xf32>
    %12 = vector.shape_cast %9 : vector<8x8xf32> to vector<1x1x8x8xf32>
    tpu.vector_store %arg5[%c0_7, %c0_8, %c0_9, %c0_10], %12 {strides = array<i32>} : memref<1x4x8x8xf32, #tpu.memory_space<vmem>>, vector<1x1x8x8xf32>,
    %13 = vector.extract_strided_slice %8 {offsets = [0, 8], sizes = [8, 8], strides = [1, 1]} : vector<8x32xf32> to vector<8x8xf32>
    %c0_11 = arith.constant 0 : index
    %c1 = arith.constant 1 : index
    %c0_12 = arith.constant 0 : index
    %c0_13 = arith.constant 0 : index
    %14 = vector.load %arg5[%c0_11, %c1, %c0_12, %c0_13] : memref<1x4x8x8xf32, #tpu.memory_space<vmem>>, vector<1x1x8x8xf32>
    %15 = vector.shape_cast %14 : vector<1x1x8x8xf32> to vector<8x8xf32>
    %16 = vector.shape_cast %13 : vector<8x8xf32> to vector<1x1x8x8xf32>
    tpu.vector_store %arg5[%c0_11, %c1, %c0_12, %c0_13], %16 {strides = array<i32>} : memref<1x4x8x8xf32, #tpu.memory_space<vmem>>, vector<1x1x8x8xf32>,
    %17 = vector.extract_strided_slice %8 {offsets = [0, 16], sizes = [8, 8], strides = [1, 1]} : vector<8x32xf32> to vector<8x8xf32>
    %c0_14 = arith.constant 0 : index
    %c2 = arith.constant 2 : index
    %c0_15 = arith.constant 0 : index
    %c0_16 = arith.constant 0 : index
    %18 = vector.load %arg5[%c0_14, %c2, %c0_15, %c0_16] : memref<1x4x8x8xf32, #tpu.memory_space<vmem>>, vector<1x1x8x8xf32>
    %19 = vector.shape_cast %18 : vector<1x1x8x8xf32> to vector<8x8xf32>
    %20 = vector.shape_cast %17 : vector<8x8xf32> to vector<1x1x8x8xf32>
    tpu.vector_store %arg5[%c0_14, %c2, %c0_15, %c0_16], %20 {strides = array<i32>} : memref<1x4x8x8xf32, #tpu.memory_space<vmem>>, vector<1x1x8x8xf32>,
    %21 = vector.extract_strided_slice %8 {offsets = [0, 24], sizes = [8, 8], strides = [1, 1]} : vector<8x32xf32> to vector<8x8xf32>
    %c0_17 = arith.constant 0 : index
    %c3 = arith.constant 3 : index
    %c0_18 = arith.constant 0 : index
    %c0_19 = arith.constant 0 : index
    %22 = vector.load %arg5[%c0_17, %c3, %c0_18, %c0_19] : memref<1x4x8x8xf32, #tpu.memory_space<vmem>>, vector<1x1x8x8xf32>
    %23 = vector.shape_cast %22 : vector<1x1x8x8xf32> to vector<8x8xf32>
    %24 = vector.shape_cast %21 : vector<8x8xf32> to vector<1x1x8x8xf32>
    tpu.vector_store %arg5[%c0_17, %c3, %c0_18, %c0_19], %24 {strides = array<i32>} : memref<1x4x8x8xf32, #tpu.memory_space<vmem>>, vector<1x1x8x8xf32>,
    return
  }
  func.func @transform_0(%arg0: i32, %arg1: i32) -> (i32, i32, i32) {
    %c0_i32 = arith.constant 0 : i32
    %c0_i32_0 = arith.constant 0 : i32
    return %arg0, %arg1, %c0_i32 : i32, i32, i32
  }
  func.func @transform_1(%arg0: i32, %arg1: i32) -> (i32, i32) {
    %c0_i32 = arith.constant 0 : i32
    %c0_i32_0 = arith.constant 0 : i32
    %c0_i32_1 = arith.constant 0 : i32
    return %c0_i32, %c0_i32_0 : i32, i32
  }
  func.func @transform_2(%arg0: i32, %arg1: i32) -> (i32, i32) {
    %c0_i32 = arith.constant 0 : i32
    %c0_i32_0 = arith.constant 0 : i32
    %c0_i32_1 = arith.constant 0 : i32
    return %c0_i32, %c0_i32_0 : i32, i32
  }
  func.func @transform_3(%arg0: i32, %arg1: i32) -> (i32, i32, i32, i32) {
    %c0_i32 = arith.constant 0 : i32
    %c0_i32_0 = arith.constant 0 : i32
    %c0_i32_1 = arith.constant 0 : i32
    return %arg0, %c0_i32, %arg1, %c0_i32_0 : i32, i32, i32, i32
  }
}

</mosaic_0001>

<bundles_post_ra>
// kernel: tpu_custom_call.1
= control target key start
LH: loop header
LB: loop body
LE: loop exit
PB: predicated region body
PF: predicated region fallthrough
CT: control target
= control target key end

     0   :  { %8 = vsyncpa [#allocation3], 0  ;;  %s814_s0 = inlined_call_operand.hbm [shape: f32[2,8,32], index: 0, kind: input, shape index: {}]   ;;  %s815_s1 = inlined_call_operand.hbm [shape: f32[32,32], index: 1, kind: input, shape index: {}]   ;;  %s816_s2 = inlined_call_operand.vmem [shape: f32[1,32], index: 2, kind: input, shape index: {}]   ;;  %s817_s3 = inlined_call_operand.hbm [shape: f32[2,4,8,8], index: 3, kind: output, shape index: {}]  }
   0x1   :  { %10 = vsyncpa [#allocation3 + $0x1], 0 }
   0x2   :  { %11 = vsyncpa [#allocation6], 0 }
   0x3   :  { %12 = vsyncpa [#allocation4], 0 }
   0x4   :  { %14 = vsyncpa [#allocation4 + $0x1], 0  ;;  %s663_s12 = smov 0   ;;  %s665_s13 = smov 0  }
   0x5   :  { %s667_s14 = smov 0   ;;  %s669_s15 = smov 0  }
   0x6   :  { %s671_s16 = smov 0   ;;  %s673_s17 = smov 0  }
   0x7 LB: > { %s385_s18 = sadd.s32 4294967295, %s633_s17   ;;  %p387_p0 = scmp.ge.s32.totalorder %s633_s17, 1  ;;  %s633_s17 = sphi %s673_s17, %s20_s17   ;;  %s629_s16 = sphi %s671_s16, %s828_s16   ;;  %s625_s15 = sphi %s669_s15, %s827_s15   ;;  %s621_s14 = sphi %s667_s14, %s826_s14   ;;  %s617_s13 = sphi %s665_s13, %s825_s13   ;;  %s613_s12 = sphi %s663_s12, %s824_s12  }
   0x8   : > { %p695_p1 = scmp.eq.s32.totalorder %s385_s18, 0  ;;  %p135_p2 = scmp.lt.s32.totalorder %s633_s17, 3 }
   0x9   : > { %s146_s22 = sshll.u32 %s815_s1, 4  ;;  %s635_s24 = smov [#allocation5]   ;;  %s147_s22 = int_to_ptr.hbm [resolvable:$true] %s146_s22 }
   0xa   : > { %p703_p3 = pnand %p387_p0, %p135_p2  ;;  %s148_s25 = sshll.u32 %s635_s24, 4  ;;  %s149_s25 = int_to_ptr.vmem [resolvable:$true] %s148_s25 }
   0xb   : > { %p389_p6 = scmp.ge.s32.totalorder %s633_s17, 2  ;;  %s636_s26 = smov 128  }
   0xc   : > { %p414_p4 = pneg %p703_p3  ;;  %s637_s27 = smov 8  }
   0xd   : > { %s386_s28 = sadd.s32 4294967294, %s633_s17   ;;  %s32_s29 = sadd.s32 1, %s629_s16 }
   0xe   : > { %p415_p5 = pnand %p414_p4, %p695_p1  ;;  %s41_s30 = sadd.s32 1, %s621_s14 }
   0xf   : > { %p34_p7 = scmp.ge.s32.totalorder %s32_s29, 2  ;;  %p48_p8 = scmp.ne.s32.totalorder %s621_s14, %s617_s13 }
  0x10   : > { %417 = dma.hbm_to_vmem [thread:$0]  (!%p415_p5), %s147_s22, 512, %s149_s25, [#allocation6], %s636_s26, %s636_s26, %s637_s27  }
  0x11   : > { %p49_p9 = scmp.eq.s32.totalorder %s633_s17, 0  ;;  %p54_p10 = scmp.ne.s32.totalorder %s617_s13, %s613_s12 }
  0x12   : > { %s830_s29 = smov (%p34_p7, %s32_s29), 0  ;;  %p122_p13 = scmp.eq.s32.totalorder %s385_s18, 1 }
  0x13   : > { %p722_p11 = por %p49_p9, %p48_p8  ;;  %p728_p12 = por %p695_p1, %p54_p10 }
  0x14   : > { %s36_s6 = ssub.s32 %s629_s16, %s830_s29  ;;  %p128_p2 = scmp.eq.s32.totalorder %s386_s28, 1 }
  0x15   : > { %p39_p0 = scmp.eq.s32.totalorder %s36_s6, 0  ;;  %p734_p4 = por %p122_p13, %p48_p8 }
  0x16   : > { %p427_p5 = scmp.lt.s32.totalorder %s633_s17, 2  ;;  %p742_p7 = por %p128_p2, %p54_p10 }
  0x17   : > { %s740_s8 = scalar_select %p39_p0, %s621_s14, %s41_s30  }
  0x18   : > { %s165_s10 = sand.u32 1, %s621_s14   ;;  %s391_s20 = sshll.u32 %s629_s16, 3 }
  0x19   : > { %s390_s11 = sshll.u32 %s165_s10, 3  ;;  %s174_s18 = scalar_lea.hbm %s814_s0, %s391_s20 }
  0x1a   : > { %s169_s24 = scalar_lea.vmem [#allocation2], %s390_s11  ;;  %s176_s26 = sshll.u32 %s174_s18, 4  ;;  %s177_s26 = int_to_ptr.hbm [resolvable:$true] %s176_s26 }
  0x1b   : > { %s178_s25 = sshll.u32 %s169_s24, 4  ;;  %p419_p8 = pnand %p427_p5, %p722_p11  ;;  %s179_s25 = int_to_ptr.vmem [resolvable:$true] %s178_s25 }
  0x1c   : > { %s166_s27 = scalar_lea.sflag [#allocation3], %s165_s10  ;;  %187 = sbr.rel (%p703_p3) target bundleno = 301 (0x12d), region = 32 }
  0x1d   : > { %421 = dma.hbm_to_vmem [thread:$0]  (!%p419_p8), %s177_s26, 128, %s179_s25, %s166_s27  }
  0x1e   : > { %s756_s28 = sand.u32 (!%p703_p3), 1, %s617_s13  }
  0x1f   : > { %s393_s30 = sshll.u32 (!%p703_p3), %s756_s28, 3  ;;  %s190_s6 = scalar_lea.sflag (!%p703_p3), [#allocation3], %s756_s28 }
  0x20   : > { %s193_s11 = scalar_lea.vmem (!%p703_p3), [#allocation2], %s393_s30 }
  0x21   : > { %600 = dma.done.wait (%p728_p12), %s190_s6, 128  }
  0x22   : > { %602 = vsyncadd (%p728_p12), %s190_s6, 4294967168 }
  0x23   : > { %604 = dma.done.wait (%p695_p1), [#allocation6], 512  }
  0x24   : > { %606 = vsyncadd (%p695_p1), [#allocation6], 4294966784  ;;  %v226_v0 = vld [vmem:[#allocation5 + $0x18] sm:$0xff]  ;;  %v225_v1 = vld [vmem:[#allocation5 + $0x10] sm:$0xff]  ;;  %vm231_vm0 = vcmask 261120   ;;  %s395_s5 = sshll.u32 %s756_s28, 5 }
  0x25   : > { %247 = vmatpush.msra.mxu0 %v226_v0  ;;  %v224_v2 = vld [vmem:[#allocation5 + $0x8] sm:$0xff]  ;;  %v223_v3 = vld [vmem:[#allocation5] sm:$0xff]  ;;  %v222_v4 = vld [vmem:[%s193_s11] sm:$0xff]  ;;  %vm256_vm1 = vcmask 64512   ;;  %s638_s19 = smov 104   ;;  %s639_s10 = smov 120  }
  0x26   : > { %v486_v5 = vld [vmem:[%s816_s2] ss:$0 sm:$0xff]  ;;  %s221_s20 = scalar_lea.vmem [#allocation7], %s395_s5  ;;  %s640_s21 = smov 112  }
  0x27   : > { %248 = vmatpush.msra.mxu0 %v225_v1  ;;  %s405_s22 = sshll.u32 %s625_s15, 5  ;;  %s288_s26 = sshll.u32 %s221_s20, 4  ;;  %s289_s26 = int_to_ptr.vmem [resolvable:$true] %s288_s26 }
  0x28   : > { %s287_s25 = scalar_lea.hbm %s817_s3, %s405_s22  ;;  %s275_s30 = scalar_lea.sflag [#allocation4], %s756_s28 }
  0x29   : > { %249 = vmatpush.msra.mxu0 %v224_v2  ;;  %s290_s27 = sshll.u32 %s287_s25, 4  ;;  %s567_s4 = scalar_lea.hbm %s817_s3, 64  ;;  %s291_s27 = int_to_ptr.hbm [resolvable:$true] %s290_s27 }
  0x2a   : > { %s561_s15 = sshra.s32 %s291_s27, 4  ;;  %s562_s15 = int_to_ptr.hbm [resolvable:$true] %s561_s15 }
  0x2b   : > { %250 = vmatpush.msra.mxu0 %v223_v3  ;;  %s563_s6 = scalar_lea.hbm %s562_s15, 32  ;;  %p568_p10 = scmp.lt.s32.totalorder %s562_s15, %s817_s3 }
  0x2c   : > { %396 = vmatmul.msk.f32.vlgmr.msra.gmra.mxu0 %vm231_vm0, %v222_v4  ;;  %p564_p1 = scmp.ne.s32.totalorder %s562_s15, %s563_s6  ;;  %p569_p11 = scmp.lt.s32.totalorder %s567_s4, %s563_s6 }
  0x2e   : > { %p565_p3 = pnand %p564_p1, %p734_p4  ;;  %p570_p12 = por %p569_p11, %p568_p10 }
  0x30   : > { %p566_p9 = pneg %p565_p3 }
  0x32   : > { %p571_p13 = pnand %p570_p12, %p566_p9 }
  0xa9   : > { %v252_v6 = vpop.f32.mrf.mxu0 }
  0xaa   : > { %v253_v7 = vadd.f32 %v486_v5, %v252_v6 }
  0xac   : > { %v255_v8 = vmul.f32 0.35355338, %v253_v7 }
  0xae   : > { %269 = vrot.lane.b32.xlu1 %v255_v8, %s638_s19  ;;  %259 = vrot.lane.b32.xlu0 %v255_v8, %s639_s10  ;;  %257 = vst.msk [vmem:[%s221_s20] sm:$0xff] %vm256_vm1, %v255_v8 }
  0xb6   : > { %264 = vrot.lane.b32.xlu0 %v255_v8, %s640_s21 }
 0x120   : > { %v270_v9 = vpop.permute.xlu1 %269  ;;  %v260_v10 = vpop.permute.xlu0 %259 }
 0x121   : > { %399 = vst.msk [vmem:[%s221_s20 + $0x18] sm:$0xff] %vm256_vm1, %v270_v9 }
 0x122   : > { %397 = vst.msk [vmem:[%s221_s20 + $0x8] sm:$0xff] %vm256_vm1, %v260_v10 }
 0x128   : > { %v265_v11 = vpop.permute.xlu0 %264 }
 0x129   : > { %398 = vst.msk [vmem:[%s221_s20 + $0x10] sm:$0xff] %vm256_vm1, %v265_v11 }
 0x12a   : > { %574 = shalt.err (!%p571_p13)
}
 0x12b   : > { %s641_s28 = smov 128   ;;  %s642_s10 = smov 8  }
 0x12c   : > { %412 = dma.vmem_to_hbm [thread:$0]  (%p734_p4), %s289_s26, 512, %s291_s27, %s275_s30, %s641_s28, %s641_s28, %s642_s10  }
 0x12d PF: > { %s305_s20 = sand.u32 1, %s613_s12   ;;  %p423_p0 = pnand %p389_p6, %p742_p7 }
 0x12e   : > { %s306_s21 = scalar_lea.sflag [#allocation4], %s305_s20 }
 0x12f   : > { %p424_p2 = pneg %p423_p0 }
 0x131   : > { %608 = dma.done.wait (%p424_p2), %s306_s21, 512  }
 0x132   : > { %610 = vsyncadd (%p424_p2), %s306_s21, 4294966784  ;;  %s20_s17 = sadd.s32 1, %s633_s17   ;;  %s824_s12 = smov %s617_s13 }
 0x133   : > { %p17_p5 = scmp.ge.s32.totalorder %s20_s17, 4   ;;  %s825_s13 = smov %s621_s14 }
 0x134   : > { %s826_s14 = smov %s740_s8  ;;  %s827_s15 = smov %s629_s16 }
 0x135   : > { %s828_s16 = smov %s830_s29  ;;  %19 = sbr.rel (!%p17_p5) target bundleno = 7 (0x7), region = 84 }
 0x13a   :  { %312 = vsyncpa [#allocation3], 1 }
 0x13b   :  { %314 = vsyncpa [#allocation3 + $0x1], 1 }
 0x13c   :  { %315 = vsyncpa [#allocation6], 1 }
 0x13d   :  { %316 = vsyncpa [#allocation4], 1 }
 0x13e   :  { %318 = vsyncpa [#allocation4 + $0x1], 1 }

</bundles_post_ra>
